<compile_context>
chip_gen: v7x
topology: tpu7x:2x2x1
jax: 0.10.0
libtpu: 0.0.40
codegen_flags: <defaults>
</compile_context>

<pallas_src>
import jax
import jax.numpy as jnp
from jax.experimental import pallas as pl
from jax.experimental.pallas import tpu as pltpu

_LANE = 128


def _round_up(n, m):
    return ((n + m - 1) // m) * m


def _mlp_kernel(x_ref, w1_ref, b1_ref, w2_ref, b2_ref, o_ref):
    # fc1: (TB, D) @ (D, Hp) -> f32 accumulator, bias add + ReLU on f32.
    h = jnp.dot(x_ref[...], w1_ref[...], preferred_element_type=jnp.float32)
    h = jnp.maximum(h + b1_ref[...], 0.0)
    # fc2: (TB, Hp) @ (Hp, Cp) -> f32 accumulator, bias add, cast on store.
    out = jnp.dot(h.astype(w2_ref.dtype), w2_ref[...],
                  preferred_element_type=jnp.float32)
    o_ref[...] = (out + b2_ref[...]).astype(o_ref.dtype)


def prepare_params(w1, b1, w2, b2, compute_dtype=jnp.float32):
    """One-time param prep (hoisted out of the forward).

    w1: (D, H), b1: (H,)|(1,H), w2: (H, C), b2: (C,)|(1,C) stored as (in, out) = W^T
    relative to torch's nn.Linear weight. Returns lane-padded (H,C -> 128) weights in
    `compute_dtype` and f32 biases, plus the true number of classes C.
    """
    D, H = w1.shape
    C = w2.shape[1]
    Hp = _round_up(max(H, _LANE), _LANE)
    Cp = _round_up(max(C, _LANE), _LANE)

    b1 = jnp.reshape(b1, (1, H))
    b2 = jnp.reshape(b2, (1, C))

    w1p = jnp.zeros((D, Hp), compute_dtype).at[:, :H].set(w1.astype(compute_dtype))
    b1p = jnp.zeros((1, Hp), jnp.float32).at[:, :H].set(b1.astype(jnp.float32))
    w2p = jnp.zeros((Hp, Cp), compute_dtype).at[:H, :C].set(w2.astype(compute_dtype))
    b2p = jnp.zeros((1, Cp), jnp.float32).at[:, :C].set(b2.astype(jnp.float32))
    return (w1p, b1p, w2p, b2p), C


def simple_nn_forward(x, padded_params, num_classes, *, tb=2048,
                      out_dtype=None, trim_output=True):
    """x: (B, D). padded_params from prepare_params(). Computes relu(x@W1+b1)@W2+b2."""
    w1p, b1p, w2p, b2p = padded_params
    B, D = x.shape
    Hp = w1p.shape[1]
    Cp = w2p.shape[1]
    compute_dtype = w1p.dtype
    out_dtype = out_dtype if out_dtype is not None else x.dtype

    # Cast x once in the wrapper (no-op for f32); halves the per-tile DMA when bf16.
    xk = x.astype(compute_dtype)

    # Batch tile: multiple of 8 sublanes, capped at tb; ensure >=2 grid steps when the
    # batch allows it so the v7x megacore actually gets both TensorCores working.
    TB = min(tb, _round_up(B, 8))
    if B >= 16 and pl.cdiv(B, TB) < 2:
        TB = _round_up(pl.cdiv(B, 2), 8)
    grid = (pl.cdiv(B, TB),)

    itemsize = jnp.dtype(compute_dtype).itemsize
    out_itemsize = jnp.dtype(out_dtype).itemsize
    cost = pl.CostEstimate(
        flops=2 * B * (D * Hp + Hp * Cp),
        transcendentals=0,
        bytes_accessed=(B * D * itemsize + B * Cp * out_itemsize
                        + (D * Hp + Hp * Cp) * itemsize + (Hp + Cp) * 4),
    )

    out_padded = pl.pallas_call(
        _mlp_kernel,
        out_shape=jax.ShapeDtypeStruct((B, Cp), out_dtype),
        grid_spec=pl.GridSpec(
            grid=grid,
            in_specs=[
                pl.BlockSpec((TB, D), lambda i: (i, 0)),    # x tile moves with grid
                pl.BlockSpec((D, Hp), lambda i: (0, 0)),    # weights stay VMEM-resident
                pl.BlockSpec((1, Hp), lambda i: (0, 0)),
                pl.BlockSpec((Hp, Cp), lambda i: (0, 0)),
                pl.BlockSpec((1, Cp), lambda i: (0, 0)),
            ],
            out_specs=pl.BlockSpec((TB, Cp), lambda i: (i, 0)),
        ),
        compiler_params=pltpu.CompilerParams(
            dimension_semantics=("parallel",),              # batch axis across TCs (v7x)
        ),
        cost_estimate=cost,
    )(xk, w1p, b1p, w2p, b2p)

    if trim_output:
        return out_padded[:, :num_classes]
    return out_padded  # consumer reads [:, :num_classes]; padded cols are exact zeros+b2 pad (=0)


def init_params(key, input_size, hidden, num_classes, dtype=jnp.float32):
    """Deterministic PyTorch-Linear-style init (uniform in +/- 1/sqrt(fan_in))."""
    k1, k2, k3, k4 = jax.random.split(key, 4)
    bound1 = 1.0 / jnp.sqrt(input_size)
    bound2 = 1.0 / jnp.sqrt(hidden)
    # stored as (in, out) = W^T relative to torch's (out, in)
    w1 = jax.random.uniform(k1, (input_size, hidden), dtype, -bound1, bound1)
    b1 = jax.random.uniform(k2, (1, hidden), dtype, -bound1, bound1)
    w2 = jax.random.uniform(k3, (hidden, num_classes), dtype, -bound2, bound2)
    b2 = jax.random.uniform(k4, (1, num_classes), dtype, -bound2, bound2)
    return w1, b1, w2, b2


def reference_forward(x, w1, b1, w2, b2):
    h = jnp.maximum(x @ w1 + b1, 0.0)
    return h @ w2 + b2


if __name__ == "__main__":
    batch = 256          # small, but enough rows to exercise batch tiling / pipelining
    input_size = 32
    hidden = 64
    num_classes = 10

    key = jax.random.PRNGKey(0)
    kx, kp = jax.random.split(key)
    x = jax.random.normal(kx, (batch, input_size), jnp.float32)
    w1, b1, w2, b2 = init_params(kp, input_size, hidden, num_classes)
    ref = reference_forward(x, w1, b1, w2, b2)

    # --- f32 path: exact semantics of the PyTorch module -------------------
    params_f32, C = prepare_params(w1, b1, w2, b2)            # one-time, outside forward
    out = simple_nn_forward(x, params_f32, C, tb=128)         # grid=(2,) -> pipelined path
    out = jax.block_until_ready(out)
    assert out.shape == (batch, num_classes)
    assert jnp.allclose(out, ref, atol=1e-5, rtol=1e-5)

    # --- bf16-operand path: halves HBM traffic (f32 accumulation) ----------
    params_bf16, _ = prepare_params(w1, b1, w2, b2, compute_dtype=jnp.bfloat16)
    out_bf16 = simple_nn_forward(x, params_bf16, C, tb=128, out_dtype=jnp.float32)
    out_bf16 = jax.block_until_ready(out_bf16)
    assert out_bf16.shape == (batch, num_classes)
    assert jnp.allclose(out_bf16, ref, atol=1e-1, rtol=1e-1)

    print("KERNEL_OK")
</pallas_src>

<mosaic_0001>
module attributes {stable_mosaic.version = 11 : i64} {
  func.func @_mlp_kernel(%arg0: i32, %arg1: memref<128x32xf32, #tpu.memory_space<vmem>>, %arg2: memref<32x128xf32, #tpu.memory_space<vmem>>, %arg3: memref<1x128xf32, #tpu.memory_space<vmem>>, %arg4: memref<128x128xf32, #tpu.memory_space<vmem>>, %arg5: memref<1x128xf32, #tpu.memory_space<vmem>>, %arg6: memref<128x128xf32, #tpu.memory_space<vmem>>) attributes {dimension_semantics = [#tpu.dimension_semantics<parallel>], iteration_bounds = array<i64: 2>, scalar_prefetch = 0 : i64, scratch_operands = 0 : i64, tpu.core_type = #tpu.core_type<tc>, window_params = [{transform_indices = @transform_0, window_bounds = array<i64: 128, 32>}, {pipeline_mode = #tpu.pipeline_mode<synchronous>, transform_indices = @transform_1, window_bounds = array<i64: 32, 128>}, {pipeline_mode = #tpu.pipeline_mode<synchronous>, transform_indices = @transform_2, window_bounds = array<i64: 1, 128>}, {pipeline_mode = #tpu.pipeline_mode<synchronous>, transform_indices = @transform_3, window_bounds = array<i64: 128, 128>}, {pipeline_mode = #tpu.pipeline_mode<synchronous>, transform_indices = @transform_4, window_bounds = array<i64: 1, 128>}, {transform_indices = @transform_5, window_bounds = array<i64: 128, 128>}]} {
    %c0 = arith.constant 0 : index
    %c0_0 = arith.constant 0 : index
    %0 = vector.load %arg1[%c0, %c0_0] : memref<128x32xf32, #tpu.memory_space<vmem>>, vector<128x32xf32>
    %c0_1 = arith.constant 0 : index
    %c0_2 = arith.constant 0 : index
    %1 = vector.load %arg2[%c0_1, %c0_2] : memref<32x128xf32, #tpu.memory_space<vmem>>, vector<32x128xf32>
    %cst = arith.constant dense<0.000000e+00> : vector<128x128xf32>
    %2 = tpu.matmul %0, %1, %cst {dimension_numbers = #tpu.dot_dimension_numbers<[1], [0], [0], [1], [0, 0, 1, 1], [], []>} : vector<128x32xf32>, vector<32x128xf32>, vector<128x128xf32> -> vector<128x128xf32>
    %c0_3 = arith.constant 0 : index
    %c0_4 = arith.constant 0 : index
    %3 = vector.load %arg3[%c0_3, %c0_4] : memref<1x128xf32, #tpu.memory_space<vmem>>, vector<1x128xf32>
    %4 = vector.broadcast %3 : vector<1x128xf32> to vector<128x128xf32>
    %5 = arith.addf %2, %4 : vector<128x128xf32>
    %cst_5 = arith.constant 0.000000e+00 : f32
    %6 = vector.broadcast %cst_5 : f32 to vector<128x128xf32>
    %7 = arith.maximumf %5, %6 : vector<128x128xf32>
    %c0_6 = arith.constant 0 : index
    %c0_7 = arith.constant 0 : index
    %8 = vector.load %arg4[%c0_6, %c0_7] : memref<128x128xf32, #tpu.memory_space<vmem>>, vector<128x128xf32>
    %cst_8 = arith.constant dense<0.000000e+00> : vector<128x128xf32>
    %9 = tpu.matmul %7, %8, %cst_8 {dimension_numbers = #tpu.dot_dimension_numbers<[1], [0], [0], [1], [0, 0, 1, 1], [], []>} : vector<128x128xf32>, vector<128x128xf32>, vector<128x128xf32> -> vector<128x128xf32>
    %c0_9 = arith.constant 0 : index
    %c0_10 = arith.constant 0 : index
    %10 = vector.load %arg5[%c0_9, %c0_10] : memref<1x128xf32, #tpu.memory_space<vmem>>, vector<1x128xf32>
    %11 = vector.broadcast %10 : vector<1x128xf32> to vector<128x128xf32>
    %12 = arith.addf %9, %11 : vector<128x128xf32>
    %c0_11 = arith.constant 0 : index
    %c0_12 = arith.constant 0 : index
    %13 = vector.load %arg6[%c0_11, %c0_12] : memref<128x128xf32, #tpu.memory_space<vmem>>, vector<128x128xf32>
    tpu.vector_store %arg6[%c0_11, %c0_12], %12 {strides = array<i32>} : memref<128x128xf32, #tpu.memory_space<vmem>>, vector<128x128xf32>,
    return
  }
  func.func @transform_0(%arg0: i32) -> (i32, i32) {
    %c0_i32 = arith.constant 0 : i32
    %c0_i32_0 = arith.constant 0 : i32
    return %arg0, %c0_i32 : i32, i32
  }
  func.func @transform_1(%arg0: i32) -> (i32, i32) {
    %c0_i32 = arith.constant 0 : i32
    %c0_i32_0 = arith.constant 0 : i32
    %c0_i32_1 = arith.constant 0 : i32
    return %c0_i32, %c0_i32_0 : i32, i32
  }
  func.func @transform_2(%arg0: i32) -> (i32, i32) {
    %c0_i32 = arith.constant 0 : i32
    %c0_i32_0 = arith.constant 0 : i32
    %c0_i32_1 = arith.constant 0 : i32
    return %c0_i32, %c0_i32_0 : i32, i32
  }
  func.func @transform_3(%arg0: i32) -> (i32, i32) {
    %c0_i32 = arith.constant 0 : i32
    %c0_i32_0 = arith.constant 0 : i32
    %c0_i32_1 = arith.constant 0 : i32
    return %c0_i32, %c0_i32_0 : i32, i32
  }
  func.func @transform_4(%arg0: i32) -> (i32, i32) {
    %c0_i32 = arith.constant 0 : i32
    %c0_i32_0 = arith.constant 0 : i32
    %c0_i32_1 = arith.constant 0 : i32
    return %c0_i32, %c0_i32_0 : i32, i32
  }
  func.func @transform_5(%arg0: i32) -> (i32, i32) {
    %c0_i32 = arith.constant 0 : i32
    %c0_i32_0 = arith.constant 0 : i32
    return %arg0, %c0_i32 : i32, i32
  }
}

</mosaic_0001>

<bundles_post_ra>
// kernel: tpu_custom_call.1
= control target key start
LH: loop header
LB: loop body
LE: loop exit
PB: predicated region body
PF: predicated region fallthrough
CT: control target
= control target key end

     0   :  { %10 = vsyncpa [#allocation3], 0  ;;  %s1313_s0 = inlined_call_operand.vmem [shape: f32[256,32], index: 0, kind: input, shape index: {}]   ;;  %s1314_s1 = inlined_call_operand.vmem [shape: f32[32,128], index: 1, kind: input, shape index: {}]   ;;  %s1315_s2 = inlined_call_operand.vmem [shape: f32[1,128], index: 2, kind: input, shape index: {}]   ;;  %s1316_s3 = inlined_call_operand.vmem [shape: f32[128,128], index: 3, kind: input, shape index: {}]   ;;  %s1317_s4 = inlined_call_operand.vmem [shape: f32[1,128], index: 4, kind: input, shape index: {}]   ;;  %s1318_s5 = inlined_call_operand.hbm [shape: f32[256,128], index: 5, kind: output, shape index: {}]  }
   0x1   :  { %12 = vsyncpa [#allocation3 + $0x1], 0  ;;  %s1088_s18 = smov 0   ;;  %s1090_s19 = smov 0  }
   0x2   :  { %s1092_s20 = smov 0   ;;  %s1094_s21 = smov 0  }
   0x3 LB: > { %s1109_s22 = sadd.s32 4294967295, %s1053_s21   ;;  %s723_s23 = sadd.s32 4294967294, %s1053_s21   ;;  %s1053_s21 = sphi %s1094_s21, %s1324_s21   ;;  %s1049_s20 = sphi %s1092_s20, %s1323_s20   ;;  %s1045_s19 = sphi %s1090_s19, %s1322_s19   ;;  %s1041_s18 = sphi %s1088_s18, %s1321_s18  }
   0x4   : > { %s1113_s24 = sadd.s32 1, %s1053_s21   ;;  %s135_s25 = sadd.s32 1, %s1049_s20 }
   0x5   : > { %s132_s26 = ssub.s32 %s1053_s21, %s1113_s24  ;;  %p145_p0 = scmp.ne.s32.totalorder %s1049_s20, %s1045_s19 }
   0x6   : > { %p133_p1 = scmp.eq.s32.totalorder %s132_s26, 0  ;;  %p146_p2 = scmp.eq.s32.totalorder %s1109_s22, 1 }
   0x7   : > { %p151_p3 = scmp.ne.s32.totalorder %s1045_s19, %s1041_s18  ;;  %p152_p4 = scmp.eq.s32.totalorder %s723_s23, 1 }
   0x8   : > { %s1124_s27 = scalar_select %p133_p1, %s1049_s20, %s135_s25  }
   0x9   : > { %p1126_p5 = por %p146_p2, %p145_p0  ;;  %p1130_p6 = por %p152_p4, %p151_p3 }
   0xa   : > { %p726_p7 = scmp.ge.s32.totalorder %s1053_s21, 1  ;;  %p191_p8 = scmp.lt.s32.totalorder %s1053_s21, 3 }
   0xc   : > { %p192_p9 = pnand %p726_p7, %p191_p8 }
   0xd   : > { %v242_v0 = vld [vmem:[%s1314_s1] sm:$0xff] (!%p192_p9)  ;;  %v243_v1 = vld [vmem:[%s1314_s1 + $0x8] sm:$0xff] (!%p192_p9)  ;;  %v244_v2 = vld [vmem:[%s1314_s1 + $0x10] sm:$0xff] (!%p192_p9)  ;;  %s728_s11 = sshll.u32 (!%p192_p9), %s1109_s22, 4  ;;  %vm253_vm0 = vcmask (!%p192_p9), 261120   ;;  %s753_s9 = sshll.u32 (!%p192_p9), %s1109_s22, 11 }
   0xe   : > { %195 = sbr.rel (%p192_p9) target bundleno = 502 (0x1f6), region = 40  ;;  %v894_v3 = vpack.c.bf16 (!%p192_p9), %v243_v1, %v242_v0  ;;  %v245_v4 = vld [vmem:[%s1314_s1 + $0x18] sm:$0xff] (!%p192_p9)  ;;  %p220_p10 = scmp.lt.s32.totalorder (!%p192_p9), %s728_s11, 31  ;;  %v463_v5 = vld [vmem:[%s1316_s3] sm:$0xff] (!%p192_p9)  ;;  %v464_v6 = vld [vmem:[%s1316_s3 + $0x8] sm:$0xff] (!%p192_p9) }
   0xf   : > { %v898_v7 = vpack.c.bf16 (!%p192_p9), %v245_v4, %v244_v2  ;;  %v902_v8 = vpack.c.bf16 (!%p192_p9), %v464_v6, %v463_v5  ;;  %v465_v9 = vld [vmem:[%s1316_s3 + $0x10] sm:$0xff] (!%p192_p9)  ;;  %v466_v10 = vld [vmem:[%s1316_s3 + $0x18] sm:$0xff] (!%p192_p9)  ;;  %v467_v12 = vld [vmem:[%s1316_s3 + $0x20] sm:$0xff] (!%p192_p9)  ;;  %s1055_s16 = smov (!%p192_p9), [#allocation2]  }
  0x10   : > { %895 = vmatprep.subr.bf16.mxu0 (!%p192_p9), %v894_v3  ;;  %v906_v11 = vpack.c.bf16 (!%p192_p9), %v466_v10, %v465_v9  ;;  %v468_v13 = vld [vmem:[%s1316_s3 + $0x28] sm:$0xff] (!%p192_p9)  ;;  %v469_v18 = vld [vmem:[%s1316_s3 + $0x30] sm:$0xff] (!%p192_p9)  ;;  %v470_v19 = vld [vmem:[%s1316_s3 + $0x38] sm:$0xff] (!%p192_p9)  ;;  %s995_s17 = sshll.u32 (!%p192_p9), %s1055_s16, 4  ;;  %s996_s17 = int_to_ptr.vmem [resolvable:$false] %s995_s17 }
  0x11   : > { %897 = vmatpush3.bf16.msra.mxu0 (!%p192_p9), %v894_v3  ;;  %934 = vmatprep.subr.bf16.mxu1 (!%p192_p9), %v902_v8  ;;  %v910_v16 = vpack.c.bf16 (!%p192_p9), %v468_v13, %v467_v12  ;;  %v914_v21 = vpack.c.bf16 (!%p192_p9), %v470_v19, %v469_v18  ;;  %v471_v23 = vld [vmem:[%s1316_s3 + $0x40] sm:$0xff] (!%p192_p9)  ;;  %v472_v24 = vld [vmem:[%s1316_s3 + $0x48] sm:$0xff] (!%p192_p9)  ;;  %v473_v28 = vld [vmem:[%s1316_s3 + $0x50] sm:$0xff] (!%p192_p9)  ;;  %s997_s23 = scalar_lea.vmem (!%p192_p9), %s996_s17, 4096 }
  0x12   : > { %899 = vmatprep.subr.bf16.mxu0 (!%p192_p9), %v898_v7  ;;  %942 = vmatpush3.bf16.msra.mxu1 (!%p192_p9), %v902_v8  ;;  %v918_v26 = vpack.c.bf16 (!%p192_p9), %v472_v24, %v471_v23  ;;  %v474_v29 = vld [vmem:[%s1316_s3 + $0x58] sm:$0xff] (!%p192_p9)  ;;  %v475_v33 = vld [vmem:[%s1316_s3 + $0x60] sm:$0xff] (!%p192_p9)  ;;  %v476_v34 = vld [vmem:[%s1316_s3 + $0x68] sm:$0xff] (!%p192_p9) }
  0x13   : > { %935 = vmatprep.subr.bf16.mxu1 (!%p192_p9), %v906_v11  ;;  %v922_v31 = vpack.c.bf16 (!%p192_p9), %v474_v29, %v473_v28  ;;  %v926_v36 = vpack.c.bf16 (!%p192_p9), %v476_v34, %v475_v33  ;;  %v477_v43 = vld [vmem:[%s1316_s3 + $0x70] sm:$0xff] (!%p192_p9)  ;;  %v478_v44 = vld [vmem:[%s1316_s3 + $0x78] sm:$0xff] (!%p192_p9)  ;;  %v730_v46 = vld [vmem:[%s1315_s2] ss:$0 sm:$0xff] (!%p192_p9) }
  0x14   : > { %v930_v45 = vpack.c.bf16 (!%p192_p9), %v478_v44, %v477_v43 }
  0x15   : > { %s1326_s11 = smov (!%p220_p10, %s728_s11), 31  ;;  %901 = vmatpush3.bf16.msra.mxu0 %v898_v7 }
  0x16   : > { %s729_s6 = sshll.u32 %s1326_s11, 3  ;;  %903 = vmatprep.subr.bf16.mxu0 %v902_v8  ;;  %943 = vmatpush3.bf16.msra.mxu1 %v906_v11  ;;  %s1264_s11 = scalar_lea.hbm %s1318_s5, %s753_s9 }
  0x17   : > { %s1170_s14 = scalar_lea.vmem %s1313_s0, %s729_s6  ;;  %936 = vmatprep.subr.bf16.mxu1 %v910_v16 }
  0x18   : > { %v226_v14 = vld [vmem:[%s1170_s14] sm:$0xff]  ;;  %v227_v15 = vld [vmem:[%s1170_s14 + $0x8] sm:$0xff]  ;;  %v228_v17 = vld [vmem:[%s1170_s14 + $0x10] sm:$0xff] }
  0x19   : > { %814 = vmatprep.mubr.msk.f32.mxu0 %vm253_vm0, %v226_v14  ;;  %v229_v20 = vld [vmem:[%s1170_s14 + $0x18] sm:$0xff]  ;;  %v230_v22 = vld [vmem:[%s1170_s14 + $0x20] sm:$0xff]  ;;  %v231_v25 = vld [vmem:[%s1170_s14 + $0x28] sm:$0xff] }
  0x1a   : > { %815 = vmatmul.mubr.msk.f32.vlgmr.msra.gmra.mrb[0].mxu0 %vm253_vm0, %v227_v15  ;;  %944 = vmatpush3.bf16.msra.mxu1 %v910_v16  ;;  %v232_v27 = vld [vmem:[%s1170_s14 + $0x30] sm:$0xff]  ;;  %v233_v30 = vld [vmem:[%s1170_s14 + $0x38] sm:$0xff]  ;;  %v234_v32 = vld [vmem:[%s1170_s14 + $0x40] sm:$0xff] }
  0x1b   : > { %817 = vmatprep.mubr.msk.f32.mxu0 %vm253_vm0, %v228_v17  ;;  %905 = vmatpush3.bf16.msra.mxu0 %v902_v8  ;;  %v235_v35 = vld [vmem:[%s1170_s14 + $0x48] sm:$0xff]  ;;  %v236_v37 = vld [vmem:[%s1170_s14 + $0x50] sm:$0xff]  ;;  %v237_v38 = vld [vmem:[%s1170_s14 + $0x58] sm:$0xff] }
  0x1c   : > { %907 = vmatprep.subr.bf16.mxu0 %v906_v11  ;;  %937 = vmatprep.subr.bf16.mxu1 %v914_v21  ;;  %v238_v39 = vld [vmem:[%s1170_s14 + $0x60] sm:$0xff]  ;;  %v239_v40 = vld [vmem:[%s1170_s14 + $0x68] sm:$0xff]  ;;  %v240_v41 = vld [vmem:[%s1170_s14 + $0x70] sm:$0xff] }
  0x1d   : > { %v241_v42 = vld [vmem:[%s1170_s14 + $0x78] sm:$0xff]  ;;  %s216_s14 = sand.u32 1, %s1045_s19  }
  0x1e   : > { %818 = vmatmul.mubr.msk.f32.gmra.mrb[2].mxu0 %vm253_vm0, %v229_v20  ;;  %945 = vmatpush3.bf16.msra.mxu1 %v914_v21  ;;  %s727_s30 = sshll.u32 %s216_s14, 7  ;;  %s1272_s22 = scalar_lea.sflag [#allocation3], %s216_s14 }
  0x1f   : > { %820 = vmatprep.mubr.msk.f32.mxu0 %vm253_vm0, %v230_v22  ;;  %909 = vmatpush3.bf16.msra.mxu0 %v906_v11  ;;  %s1243_s8 = scalar_lea.vmem [#allocation2], %s727_s30 }
  0x20   : > { %911 = vmatprep.subr.bf16.mxu0 %v910_v16  ;;  %938 = vmatprep.subr.bf16.mxu1 %v918_v26  ;;  %s661_s10 = sshll.u32 %s1243_s8, 4  ;;  %s1266_s10 = int_to_ptr.vmem [resolvable:$true] %s661_s10 }
  0x21   : > { %s991_s15 = scalar_lea.vmem %s1266_s10, 2048  ;;  %p998_p0 = scmp.lt.s32.totalorder %s1266_s10, %s996_s17 }
  0x22   : > { %821 = vmatmul.mubr.msk.f32.gmra.mrb[4].mxu0 %vm253_vm0, %v231_v25  ;;  %946 = vmatpush3.bf16.msra.mxu1 %v918_v26  ;;  %p992_p11 = scmp.ne.s32.totalorder %s1266_s10, %s991_s15  ;;  %p999_p1 = scmp.lt.s32.totalorder %s997_s23, %s991_s15 }
  0x23   : > { %823 = vmatprep.mubr.msk.f32.mxu0 %vm253_vm0, %v232_v27  ;;  %913 = vmatpush3.bf16.msra.mxu0 %v910_v16 }
  0x24   : > { %915 = vmatprep.subr.bf16.mxu0 %v914_v21  ;;  %939 = vmatprep.subr.bf16.mxu1 %v922_v31  ;;  %p993_p12 = pnand %p992_p11, %p1126_p5  ;;  %p1000_p2 = por %p999_p1, %p998_p0 }
  0x26   : > { %824 = vmatmul.mubr.msk.f32.gmra.mrb[6].mxu0 %vm253_vm0, %v233_v30  ;;  %947 = vmatpush3.bf16.msra.mxu1 %v922_v31  ;;  %p994_p13 = pneg %p993_p12 }
  0x27   : > { %826 = vmatprep.mubr.msk.f32.mxu0 %vm253_vm0, %v234_v32  ;;  %917 = vmatpush3.bf16.msra.mxu0 %v914_v21 }
  0x28   : > { %919 = vmatprep.subr.bf16.mxu0 %v918_v26  ;;  %940 = vmatprep.subr.bf16.mxu1 %v926_v36  ;;  %p1001_p3 = pnand %p1000_p2, %p994_p13 }
  0x2a   : > { %827 = vmatmul.mubr.msk.f32.gmra.mrb[8].mxu0 %vm253_vm0, %v235_v35  ;;  %948 = vmatpush3.bf16.msra.mxu1 %v926_v36 }
  0x2b   : > { %829 = vmatprep.mubr.msk.f32.mxu0 %vm253_vm0, %v236_v37  ;;  %921 = vmatpush3.bf16.msra.mxu0 %v918_v26 }
  0x2c   : > { %923 = vmatprep.subr.bf16.mxu0 %v922_v31  ;;  %941 = vmatprep.subr.bf16.mxu1 %v930_v45 }
  0x2e   : > { %830 = vmatmul.mubr.msk.f32.gmra.mrb[10].mxu0 %vm253_vm0, %v237_v38  ;;  %949 = vmatpush3.bf16.msra.mxu1 %v930_v45 }
  0x2f   : > { %832 = vmatprep.mubr.msk.f32.mxu0 %vm253_vm0, %v238_v39  ;;  %925 = vmatpush3.bf16.msra.mxu0 %v922_v31  ;;  %v747_v31 = vld [vmem:[%s1317_s4] ss:$0 sm:$0xff] }
  0x30   : > { %927 = vmatprep.subr.bf16.mxu0 %v926_v36 }
  0x32   : > { %833 = vmatmul.mubr.msk.f32.gmra.mrb[12].mxu0 %vm253_vm0, %v239_v40 }
  0x33   : > { %835 = vmatprep.mubr.msk.f32.mxu0 %vm253_vm0, %v240_v41  ;;  %929 = vmatpush3.bf16.msra.mxu0 %v926_v36 }
  0x34   : > { %931 = vmatprep.subr.bf16.mxu0 %v930_v45 }
  0x36   : > { %836 = vmatmul.mubr.msk.f32.gmra.mrb[14].mxu0 %vm253_vm0, %v241_v42 }
  0x37   : > { %933 = vmatpush3.bf16.msra.mxu0 %v930_v45 }
  0xed   : > { %v816_v47 = vpop.f32.mrb[0].mxu0 }
  0xee   : > { %v374_v48 = vadd.f32 %v816_v47, %v730_v46  ;;  %v368_v49 = vpop.f32.mrb[1].mxu0 }
  0xef   : > { %v369_v50 = vadd.f32 %v730_v46, %v368_v49 }
  0xf0   : > { %v448_v53 = vmax.f32 %v374_v48, 0.0 }
  0xf1   : > { %v447_v51 = vmax.f32 %v369_v50, 0.0  ;;  %v819_v52 = vpop.f32.mrb[2].mxu0 }
  0xf2   : > { %v384_v54 = vadd.f32 %v819_v52, %v730_v46  ;;  %v378_v55 = vpop.f32.mrb[3].mxu0 }
  0xf3   : > { %v379_v56 = vadd.f32 %v730_v46, %v378_v55  ;;  %870 = vmatprep.mubr.f32.mxu0 %v447_v51 }
  0xf4   : > { %871 = vmatmul.mubr.f32.vlgmr.msra.gmra.mrb[16].mxu0 %v448_v53  ;;  %v450_v59 = vmax.f32 %v384_v54, 0.0 }
  0xf5   : > { %v449_v57 = vmax.f32 %v379_v56, 0.0  ;;  %v822_v58 = vpop.f32.mrb[4].mxu0 }
  0xf6   : > { %v394_v60 = vadd.f32 %v822_v58, %v730_v46  ;;  %v388_v61 = vpop.f32.mrb[5].mxu0 }
  0xf7   : > { %v389_v62 = vadd.f32 %v730_v46, %v388_v61  ;;  %873 = vmatprep.mubr.f32.mxu0 %v449_v57 }
  0xf8   : > { %874 = vmatmul.mubr.f32.gmra.mrb[18].mxu0 %v450_v59  ;;  %v452_v1 = vmax.f32 %v394_v60, 0.0 }
  0xf9   : > { %v451_v63 = vmax.f32 %v389_v62, 0.0  ;;  %v825_v0 = vpop.f32.mrb[6].mxu0 }
  0xfa   : > { %v404_v2 = vadd.f32 %v825_v0, %v730_v46  ;;  %v398_v3 = vpop.f32.mrb[7].mxu0 }
  0xfb   : > { %876 = vmatprep.mubr.f32.mxu0 %v451_v63  ;;  %v399_v4 = vadd.f32 %v730_v46, %v398_v3 }
  0xfc   : > { %877 = vmatmul.mubr.f32.gmra.mrb[20].mxu0 %v452_v1  ;;  %v454_v7 = vmax.f32 %v404_v2, 0.0 }
  0xfd   : > { %v828_v5 = vpop.f32.mrb[8].mxu0  ;;  %v453_v6 = vmax.f32 %v399_v4, 0.0 }
  0xfe   : > { %v414_v8 = vadd.f32 %v828_v5, %v730_v46  ;;  %v408_v9 = vpop.f32.mrb[9].mxu0 }
  0xff   : > { %v409_v10 = vadd.f32 %v730_v46, %v408_v9  ;;  %879 = vmatprep.mubr.f32.mxu1 %v453_v6 }
 0x100   : > { %880 = vmatmul.mubr.f32.vlgmr.msra.gmra.mrb[0].mxu1 %v454_v7  ;;  %v456_v13 = vmax.f32 %v414_v8, 0.0 }
 0x101   : > { %v455_v11 = vmax.f32 %v409_v10, 0.0  ;;  %v831_v12 = vpop.f32.mrb[10].mxu0 }
 0x102   : > { %v424_v14 = vadd.f32 %v831_v12, %v730_v46  ;;  %v418_v15 = vpop.f32.mrb[11].mxu0 }
 0x103   : > { %v419_v16 = vadd.f32 %v730_v46, %v418_v15  ;;  %882 = vmatprep.mubr.f32.mxu1 %v455_v11 }
 0x104   : > { %883 = vmatmul.mubr.f32.gmra.mrb[2].mxu1 %v456_v13  ;;  %v458_v19 = vmax.f32 %v424_v14, 0.0 }
 0x105   : > { %v457_v17 = vmax.f32 %v419_v16, 0.0  ;;  %v834_v18 = vpop.f32.mrb[12].mxu0 }
 0x106   : > { %v434_v20 = vadd.f32 %v834_v18, %v730_v46  ;;  %v428_v21 = vpop.f32.mrb[13].mxu0 }
 0x107   : > { %v429_v22 = vadd.f32 %v730_v46, %v428_v21  ;;  %885 = vmatprep.mubr.f32.mxu1 %v457_v17 }
 0x108   : > { %886 = vmatmul.mubr.f32.gmra.mrb[4].mxu1 %v458_v19  ;;  %v460_v25 = vmax.f32 %v434_v20, 0.0 }
 0x109   : > { %v459_v23 = vmax.f32 %v429_v22, 0.0  ;;  %v837_v24 = vpop.f32.mrb[14].mxu0 }
 0x10a   : > { %v444_v26 = vadd.f32 %v837_v24, %v730_v46  ;;  %v438_v27 = vpop.f32.mrb[15].mxu0 }
 0x10b   : > { %v439_v28 = vadd.f32 %v730_v46, %v438_v27  ;;  %888 = vmatprep.mubr.f32.mxu1 %v459_v23 }
 0x10c   : > { %889 = vmatmul.mubr.f32.gmra.mrb[6].mxu1 %v460_v25  ;;  %v462_v30 = vmax.f32 %v444_v26, 0.0 }
 0x10d   : > { %v461_v29 = vmax.f32 %v439_v28, 0.0 }
 0x10f   : > { %891 = vmatprep.mubr.f32.mxu1 %v461_v29 }
 0x110   : > { %892 = vmatmul.mubr.f32.gmra.mrb[8].mxu1 %v462_v30 }
 0x1c7   : > { %v872_v32 = vpop.f32.mrb[16].mxu0 }
 0x1c8   : > { %v558_v33 = vadd.f32 %v872_v32, %v747_v31  ;;  %v552_v34 = vpop.f32.mrb[17].mxu0 }
 0x1c9   : > { %v553_v35 = vadd.f32 %v747_v31, %v552_v34 }
 0x1ca   : > { %632 = vst [vmem:[%s1243_s8 + $0x8] sm:$0xff] %v558_v33 }
 0x1cb   : > { %631 = vst [vmem:[%s1243_s8] sm:$0xff] %v553_v35  ;;  %v875_v36 = vpop.f32.mrb[18].mxu0 }
 0x1cc   : > { %v568_v37 = vadd.f32 %v875_v36, %v747_v31  ;;  %v562_v38 = vpop.f32.mrb[19].mxu0 }
 0x1cd   : > { %v563_v39 = vadd.f32 %v747_v31, %v562_v38 }
 0x1ce   : > { %634 = vst [vmem:[%s1243_s8 + $0x18] sm:$0xff] %v568_v37 }
 0x1cf   : > { %633 = vst [vmem:[%s1243_s8 + $0x10] sm:$0xff] %v563_v39  ;;  %v878_v40 = vpop.f32.mrb[20].mxu0 }
 0x1d0   : > { %v578_v41 = vadd.f32 %v878_v40, %v747_v31  ;;  %v572_v42 = vpop.f32.mrb[21].mxu0 }
 0x1d1   : > { %v573_v43 = vadd.f32 %v747_v31, %v572_v42 }
 0x1d2   : > { %636 = vst [vmem:[%s1243_s8 + $0x28] sm:$0xff] %v578_v41 }
 0x1d3   : > { %635 = vst [vmem:[%s1243_s8 + $0x20] sm:$0xff] %v573_v43  ;;  %v881_v44 = vpop.f32.mrb[0].mxu1 }
 0x1d4   : > { %v588_v45 = vadd.f32 %v881_v44, %v747_v31  ;;  %v582_v46 = vpop.f32.mrb[1].mxu1 }
 0x1d5   : > { %v583_v47 = vadd.f32 %v747_v31, %v582_v46 }
 0x1d6   : > { %638 = vst [vmem:[%s1243_s8 + $0x38] sm:$0xff] %v588_v45 }
 0x1d7   : > { %637 = vst [vmem:[%s1243_s8 + $0x30] sm:$0xff] %v583_v47  ;;  %v884_v48 = vpop.f32.mrb[2].mxu1 }
 0x1d8   : > { %v598_v49 = vadd.f32 %v884_v48, %v747_v31  ;;  %v592_v50 = vpop.f32.mrb[3].mxu1 }
 0x1d9   : > { %v593_v51 = vadd.f32 %v747_v31, %v592_v50 }
 0x1da   : > { %640 = vst [vmem:[%s1243_s8 + $0x48] sm:$0xff] %v598_v49 }
 0x1db   : > { %639 = vst [vmem:[%s1243_s8 + $0x40] sm:$0xff] %v593_v51  ;;  %v887_v52 = vpop.f32.mrb[4].mxu1 }
 0x1dc   : > { %v608_v53 = vadd.f32 %v887_v52, %v747_v31  ;;  %v602_v54 = vpop.f32.mrb[5].mxu1 }
 0x1dd   : > { %v603_v55 = vadd.f32 %v747_v31, %v602_v54 }
 0x1de   : > { %642 = vst [vmem:[%s1243_s8 + $0x58] sm:$0xff] %v608_v53 }
 0x1df   : > { %641 = vst [vmem:[%s1243_s8 + $0x50] sm:$0xff] %v603_v55  ;;  %v890_v56 = vpop.f32.mrb[6].mxu1 }
 0x1e0   : > { %v618_v57 = vadd.f32 %v890_v56, %v747_v31  ;;  %v612_v58 = vpop.f32.mrb[7].mxu1 }
 0x1e1   : > { %v613_v59 = vadd.f32 %v747_v31, %v612_v58 }
 0x1e2   : > { %644 = vst [vmem:[%s1243_s8 + $0x68] sm:$0xff] %v618_v57 }
 0x1e3   : > { %643 = vst [vmem:[%s1243_s8 + $0x60] sm:$0xff] %v613_v59  ;;  %v893_v60 = vpop.f32.mrb[8].mxu1 }
 0x1e4   : > { %v628_v61 = vadd.f32 %v893_v60, %v747_v31  ;;  %v622_v62 = vpop.f32.mrb[9].mxu1 }
 0x1e5   : > { %v623_v63 = vadd.f32 %v747_v31, %v622_v62 }
 0x1e6   : > { %646 = vst [vmem:[%s1243_s8 + $0x78] sm:$0xff] %v628_v61 }
 0x1e7   : > { %645 = vst [vmem:[%s1243_s8 + $0x70] sm:$0xff] %v623_v63 }
 0x1e8   : > { %1004 = shalt.err (!%p1001_p3)
}
 0x1e9   : > { %s1005_s25 = scalar_lea.hbm %s1264_s11, 2048  ;;  %s1009_s30 = scalar_lea.hbm %s1318_s5, 4096 }
 0x1ea   : > { %p1006_p4 = scmp.ne.s32.totalorder %s1264_s11, %s1005_s25  ;;  %p1010_p9 = scmp.lt.u32.totalorder %s1264_s11, %s1318_s5 }
 0x1eb   : > { %p1011_p10 = scmp.lt.u32.totalorder %s1009_s30, %s1005_s25  ;;  %p1013_p12 = scmp.lt.u32.totalorder %s1005_s25, %s1264_s11 }
 0x1ec   : > { %p1007_p7 = pnand %p1006_p4, %p1126_p5 }
 0x1ed   : > { %p1012_p11 = por %p1011_p10, %p1010_p9 }
 0x1ee   : > { %p1008_p8 = pneg %p1007_p7 }
 0x1ef   : > { %p1014_p13 = por %p1013_p12, %p1012_p11 }
 0x1f1   : > { %p1015_p0 = pnand %p1014_p13, %p1008_p8 }
 0x1f3   : > { %1018 = shalt.err (!%p1015_p0)
}
 0x1f4   : > { %s1056_s8 = smov 128   ;;  %s1057_s9 = smov 8  }
 0x1f5   : > { %950 = dma.vmem_to_hbm [thread:$0]  (%p1126_p5), %s1266_s10, 2048, %s1264_s11, %s1272_s22, %s1056_s8, %s1056_s8, %s1057_s9  }
 0x1f6 PF: > { %p956_p1 = scmp.ge.s32.totalorder %s1053_s21, 2  ;;  %s676_s12 = sand.u32 1, %s1041_s18  }
 0x1f7   : > { %s677_s13 = scalar_lea.sflag [#allocation3], %s676_s12 }
 0x1f8   : > { %p953_p2 = pnand %p956_p1, %p1130_p6 }
 0x1fa   : > { %1036 = dma.done.wait (!%p953_p2), %s677_s13, 2048  }
 0x1fb   : > { %1038 = vsyncadd (!%p953_p2), %s677_s13, 4294965248  ;;  %p15_p3 = scmp.ge.s32.totalorder %s1113_s24, 4   ;;  %s1321_s18 = smov %s1045_s19 }
 0x1fc   : > { %s1322_s19 = smov %s1049_s20  ;;  %s1323_s20 = smov %s1124_s27 }
 0x1fd   : > { %s1324_s21 = smov %s1113_s24  ;;  %17 = sbr.rel (!%p15_p3) target bundleno = 3 (0x3), region = 75 }
 0x204   :  { %682 = vsyncpa [#allocation3], 1 }
 0x205   :  { %684 = vsyncpa [#allocation3 + $0x1], 1 }

</bundles_post_ra>
